<compile_context>
chip_gen: v7x
topology: tpu7x:2x2x1
jax: 0.10.0
libtpu: 0.0.40
codegen_flags: <defaults>
</compile_context>

<pallas_src>
import jax
import jax.numpy as jnp
from jax.experimental import pallas as pl
from jax.experimental.pallas import tpu as pltpu


# ----------------------------------------------------------------------------
# Stage 1: fused Q/K/V projection (1x1 convs), computed once, stored in bf16.
# ----------------------------------------------------------------------------
def _qkv_proj_kernel(x_ref,      # VMEM (1, C, tp)        f32
                     w_ref,      # VMEM (2*cqp + C, C)    bf16  [Wq_pad; Wk_pad; Wv]
                     b_ref,      # VMEM (2*cqp + C, 1)    f32   [bq_pad; 0; bv]
                     q_ref,      # VMEM (1, cqp, tp)      bf16
                     k_ref,      # VMEM (1, cqp, tp)      bf16
                     v_ref):     # VMEM (1, C,  tp)       bf16
    cqp = q_ref.shape[1]
    x = x_ref[0].astype(jnp.bfloat16)                                  # (C, tp)
    qkv = jnp.dot(w_ref[...], x,
                  preferred_element_type=jnp.float32) + b_ref[...]    # (2cqp+C, tp)
    q_ref[0] = qkv[:cqp, :].astype(jnp.bfloat16)
    k_ref[0] = qkv[cqp:2 * cqp, :].astype(jnp.bfloat16)
    v_ref[0] = qkv[2 * cqp:, :].astype(jnp.bfloat16)


# ----------------------------------------------------------------------------
# Stage 2: flash attention with online softmax, everything kept (chan, N).
# ----------------------------------------------------------------------------
def _flash_attn_kernel(gamma_ref,   # SMEM (1,)            f32
                       q_ref,       # VMEM (1, cqp, tq)    bf16
                       xq_ref,      # VMEM (1, C, tq)      f32   (residual)
                       k_ref,       # VMEM (1, cqp, tk)    bf16
                       v_ref,       # VMEM (1, C,  tk)     bf16
                       out_ref,     # VMEM (1, C, tq)      f32
                       m_scr,       # VMEM (1, tq)         f32   running max
                       l_scr,       # VMEM (1, tq)         f32   running sum
                       acc_scr):    # VMEM (C, tq)         f32   un-normalized out
    ki = pl.program_id(2)
    nk = pl.num_programs(2)

    @pl.when(ki == 0)
    def _init():
        m_scr[...] = jnp.full(m_scr.shape, -jnp.inf, m_scr.dtype)
        l_scr[...] = jnp.zeros(l_scr.shape, l_scr.dtype)
        acc_scr[...] = jnp.zeros(acc_scr.shape, acc_scr.dtype)

    q = q_ref[0]                                                       # (cqp, tq)
    k = k_ref[0]                                                       # (cqp, tk)
    v = v_ref[0]                                                       # (C,  tk)

    # Energy tile with keys on sublanes, queries on lanes: no transposes needed.
    e = jax.lax.dot_general(k, q, (((0,), (0,)), ((), ())),
                            preferred_element_type=jnp.float32)        # (tk, tq)

    m_prev = m_scr[...]                                                # (1, tq)
    m_new = jnp.maximum(m_prev, jnp.max(e, axis=0, keepdims=True))     # (1, tq)
    alpha = jnp.exp(m_prev - m_new)                                    # (1, tq)
    p = jnp.exp(e - m_new)                                             # (tk, tq) f32
    l_scr[...] = alpha * l_scr[...] + jnp.sum(p, axis=0, keepdims=True)
    pv = jax.lax.dot_general(v, p.astype(jnp.bfloat16),
                             (((1,), (0,)), ((), ())),
                             preferred_element_type=jnp.float32)       # (C, tq)
    acc_scr[...] = alpha * acc_scr[...] + pv
    m_scr[...] = m_new

    @pl.when(ki == nk - 1)
    def _done():
        o = acc_scr[...] * pl.reciprocal(l_scr[...], approx=True)      # (C, tq)
        out_ref[0] = gamma_ref[0] * o + xq_ref[0]


# ----------------------------------------------------------------------------
# Wrapper
# ----------------------------------------------------------------------------
def _pick_tile(n, cap):
    """Largest tile <= cap that divides n and is lane-legal
    (multiple of 128, or the full extent n)."""
    if n <= cap:
        return n
    t = (cap // 128) * 128
    while t >= 128:
        if n % t == 0:
            return t
        t -= 128
    return n  # single tile: always legal


def _flash_vmem_bytes(C, cqp, tq, tk):
    """Footprint estimate: double-buffered blocks + scratch + e/p temporaries."""
    blocks = 2 * (cqp * tq * 2      # Q tile   (bf16)
                  + C * tq * 4      # x residual tile (f32)
                  + cqp * tk * 2    # K tile   (bf16)
                  + C * tk * 2      # V tile   (bf16)
                  + C * tq * 4)     # out tile (f32)
    scratch = C * tq * 4 + 2 * 8 * tq * 4
    temps = 3 * tk * tq * 4         # e / p / rescale temporaries (f32)
    return blocks + scratch + temps


def self_attn_pallas(x_nchw, params, *, tq_cap=512, tk_cap=1024, tp_cap=512):
    """x_nchw: (B, C, W, H) float32.  Returns (B, C, W, H), matching torch forward."""
    B, C, W, H = x_nchw.shape
    N = W * H
    cq = C // 8
    cqp = max(8, ((cq + 7) // 8) * 8)   # pad q/k channels to a full sublane tile

    wq, bq, wk, bk, wv, bv, gamma = params  # PyTorch conv layout: w (out, in), b (out,)
    del bk                                  # softmax over keys is invariant to bk

    f32, bf16 = jnp.float32, jnp.bfloat16

    # Fused, padded projection weights [Wq_pad ; Wk_pad ; Wv] and biases.
    wqkv = jnp.zeros((2 * cqp + C, C), f32)
    wqkv = wqkv.at[:cq].set(wq).at[cqp:cqp + cq].set(wk).at[2 * cqp:].set(wv)
    wqkv = wqkv.astype(bf16)
    bqkv = jnp.zeros((2 * cqp + C, 1), f32)
    bqkv = bqkv.at[:cq, 0].set(bq).at[2 * cqp:, 0].set(bv)

    # NCHW -> (B, C, N): identical memory order to torch .view(B, C, W*H).
    x_cn = x_nchw.reshape(B, C, N).astype(f32)

    # ---- Stage 1: Q/K/V projection (once, bf16 outputs) ----
    tp = _pick_tile(N, tp_cap)
    q_all, k_all, v_all = pl.pallas_call(
        _qkv_proj_kernel,
        out_shape=(
            jax.ShapeDtypeStruct((B, cqp, N), bf16),
            jax.ShapeDtypeStruct((B, cqp, N), bf16),
            jax.ShapeDtypeStruct((B, C, N), bf16),
        ),
        grid=(B, N // tp),
        in_specs=[
            pl.BlockSpec((1, C, tp), lambda b, j: (b, 0, j)),
            pl.BlockSpec((2 * cqp + C, C), lambda b, j: (0, 0)),
            pl.BlockSpec((2 * cqp + C, 1), lambda b, j: (0, 0)),
        ],
        out_specs=(
            pl.BlockSpec((1, cqp, tp), lambda b, j: (b, 0, j)),
            pl.BlockSpec((1, cqp, tp), lambda b, j: (b, 0, j)),
            pl.BlockSpec((1, C, tp), lambda b, j: (b, 0, j)),
        ),
        compiler_params=pltpu.CompilerParams(
            dimension_semantics=("parallel", "parallel")),
    )(x_cn, wqkv, bqkv)

    # ---- Stage 2: flash attention ----
    tq_cap_eff = tq_cap
    if B == 1 and N >= 256:
        # keep >= 2 parallel iterations so both v7x TensorCores stay busy
        tq_cap_eff = min(tq_cap, N // 2)
    tq = _pick_tile(N, tq_cap_eff)
    tk = _pick_tile(N, tk_cap)
    grid = (B, N // tq, N // tk)

    est = _flash_vmem_bytes(C, cqp, tq, tk)
    # >= 32 MiB (raises v5e's 16 MiB default), <= 48 MiB (safe on v7x's 64 MiB).
    vmem_limit = int(min(max(est * 3 // 2 + (2 << 20), 32 << 20), 48 << 20))

    out_cn = pl.pallas_call(
        _flash_attn_kernel,
        out_shape=jax.ShapeDtypeStruct((B, C, N), f32),
        grid=grid,
        in_specs=[
            pl.BlockSpec(memory_space=pltpu.SMEM),                      # gamma (1,)
            pl.BlockSpec((1, cqp, tq), lambda b, qi, ki: (b, 0, qi)),   # Q tile
            pl.BlockSpec((1, C, tq), lambda b, qi, ki: (b, 0, qi)),     # x (residual)
            pl.BlockSpec((1, cqp, tk), lambda b, qi, ki: (b, 0, ki)),   # K tile
            pl.BlockSpec((1, C, tk), lambda b, qi, ki: (b, 0, ki)),     # V tile
        ],
        out_specs=pl.BlockSpec((1, C, tq), lambda b, qi, ki: (b, 0, qi)),
        scratch_shapes=[
            pltpu.VMEM((1, tq), f32),    # running max
            pltpu.VMEM((1, tq), f32),    # running sum
            pltpu.VMEM((C, tq), f32),    # un-normalized output accumulator
        ],
        compiler_params=pltpu.CompilerParams(
            dimension_semantics=("parallel", "parallel", "arbitrary"),
            vmem_limit_bytes=vmem_limit),
    )(gamma, q_all, x_cn, k_all, v_all)

    return out_cn.reshape(B, C, W, H)


# ----------------------------------------------------------------------------
# Parameters + pure-JAX reference (mirrors the PyTorch forward exactly).
# ----------------------------------------------------------------------------
def init_params(key, C):
    """Conv2d(k=1) params in PyTorch layout: w (out, in), b (out,); gamma (1,)."""
    cq = C // 8
    k1, k2, k3, k4, k5, k6 = jax.random.split(key, 6)
    s = 0.1
    wq = s * jax.random.normal(k1, (cq, C), jnp.float32)
    bq = s * jax.random.normal(k2, (cq,), jnp.float32)
    wk = s * jax.random.normal(k3, (cq, C), jnp.float32)
    bk = s * jax.random.normal(k4, (cq,), jnp.float32)
    wv = s * jax.random.normal(k5, (C, C), jnp.float32)
    bv = s * jax.random.normal(k6, (C,), jnp.float32)
    # PyTorch initializes gamma to 0 (out == x); use a nonzero gamma so the
    # test actually exercises the attention path.
    gamma = jnp.full((1,), 0.5, jnp.float32)
    return (wq, bq, wk, bk, wv, bv, gamma)


def self_attn_ref(x_nchw, params):
    """Pure-JAX f32 reference mirroring the PyTorch forward exactly (incl. bk)."""
    wq, bq, wk, bk, wv, bv, gamma = params
    B, C, W, H = x_nchw.shape
    N = W * H
    x_cn = x_nchw.reshape(B, C, N)
    q = jnp.einsum('oc,bcn->bon', wq, x_cn) + bq[None, :, None]    # (B, Cq, N)
    k = jnp.einsum('oc,bcn->bon', wk, x_cn) + bk[None, :, None]    # (B, Cq, N)
    v = jnp.einsum('oc,bcn->bon', wv, x_cn) + bv[None, :, None]    # (B, C, N)
    energy = jnp.einsum('bdn,bdm->bnm', q, k)                      # (B, N, N)
    attn = jax.nn.softmax(energy, axis=-1)
    out = jnp.einsum('bcm,bnm->bcn', v, attn)                      # (B, C, N)
    return gamma[0] * out.reshape(B, C, W, H) + x_nchw


if __name__ == "__main__":
    key = jax.random.PRNGKey(0)
    kx, kp = jax.random.split(key)

    B, C, W, H = 2, 32, 16, 16     # in_dim=32 -> query/key channels = 4; N = 256
    x = jax.random.normal(kx, (B, C, W, H), jnp.float32)
    params = init_params(kp, C)

    ref = self_attn_ref(x, params)

    # Default caps: single tile per axis at this small N.
    out1 = jax.block_until_ready(self_attn_pallas(x, params))
    # Small caps: exercises the multi-tile online-softmax recurrence
    # (grid = (2, 2, 2)) and the query-tile grid axis.
    out2 = jax.block_until_ready(
        self_attn_pallas(x, params, tq_cap=128, tk_cap=128, tp_cap=128))

    for out in (out1, out2):
        assert out.shape == (B, C, W, H)
        err = jnp.max(jnp.abs(out - ref))
        # bf16 MXU inputs (f32 accumulation / f32 softmax) => relaxed tolerance.
        assert jnp.allclose(out, ref, atol=2e-2, rtol=2e-2), f"max abs err {err}"

    print("KERNEL_OK")
</pallas_src>

<mosaic_0001>
module attributes {stable_mosaic.version = 11 : i64} {
  func.func @_qkv_proj_kernel(%arg0: i32, %arg1: i32, %arg2: memref<1x32x256xf32, #tpu.memory_space<vmem>>, %arg3: memref<48x32xbf16, #tpu.memory_space<vmem>>, %arg4: memref<48x1xf32, #tpu.memory_space<vmem>>, %arg5: memref<1x8x256xbf16, #tpu.memory_space<vmem>>, %arg6: memref<1x8x256xbf16, #tpu.memory_space<vmem>>, %arg7: memref<1x32x256xbf16, #tpu.memory_space<vmem>>) attributes {dimension_semantics = [#tpu.dimension_semantics<parallel>, #tpu.dimension_semantics<parallel>], iteration_bounds = array<i64: 2, 1>, scalar_prefetch = 0 : i64, scratch_operands = 0 : i64, tpu.core_type = #tpu.core_type<tc>, window_params = [{transform_indices = @transform_0, window_bounds = array<i64: 1, 32, 256>}, {pipeline_mode = #tpu.pipeline_mode<synchronous>, transform_indices = @transform_1, window_bounds = array<i64: 48, 32>}, {pipeline_mode = #tpu.pipeline_mode<synchronous>, transform_indices = @transform_2, window_bounds = array<i64: 48, 1>}, {transform_indices = @transform_3, window_bounds = array<i64: 1, 8, 256>}, {transform_indices = @transform_4, window_bounds = array<i64: 1, 8, 256>}, {transform_indices = @transform_5, window_bounds = array<i64: 1, 32, 256>}]} {
    %c0 = arith.constant 0 : index
    %c0_0 = arith.constant 0 : index
    %c0_1 = arith.constant 0 : index
    %0 = vector.load %arg2[%c0, %c0_0, %c0_1] : memref<1x32x256xf32, #tpu.memory_space<vmem>>, vector<1x32x256xf32>
    %1 = vector.shape_cast %0 : vector<1x32x256xf32> to vector<32x256xf32>
    %2 = arith.truncf %1 : vector<32x256xf32> to vector<32x256xbf16>
    %c0_2 = arith.constant 0 : index
    %c0_3 = arith.constant 0 : index
    %3 = vector.load %arg3[%c0_2, %c0_3] : memref<48x32xbf16, #tpu.memory_space<vmem>>, vector<48x32xbf16>
    %cst = arith.constant dense<0.000000e+00> : vector<48x256xf32>
    %4 = tpu.matmul %3, %2, %cst {dimension_numbers = #tpu.dot_dimension_numbers<[1], [0], [0], [1], [0, 0, 1, 1], [], []>} : vector<48x32xbf16>, vector<32x256xbf16>, vector<48x256xf32> -> vector<48x256xf32>
    %c0_4 = arith.constant 0 : index
    %c0_5 = arith.constant 0 : index
    %5 = vector.load %arg4[%c0_4, %c0_5] : memref<48x1xf32, #tpu.memory_space<vmem>>, vector<48x1xf32>
    %6 = vector.broadcast %5 : vector<48x1xf32> to vector<48x256xf32>
    %7 = arith.addf %4, %6 : vector<48x256xf32>
    %8 = vector.extract_strided_slice %7 {offsets = [0, 0], sizes = [8, 256], strides = [1, 1]} : vector<48x256xf32> to vector<8x256xf32>
    %9 = arith.truncf %8 : vector<8x256xf32> to vector<8x256xbf16>
    %c0_6 = arith.constant 0 : index
    %c0_7 = arith.constant 0 : index
    %c0_8 = arith.constant 0 : index
    %10 = vector.load %arg5[%c0_6, %c0_7, %c0_8] : memref<1x8x256xbf16, #tpu.memory_space<vmem>>, vector<1x8x256xbf16>
    %11 = vector.shape_cast %10 : vector<1x8x256xbf16> to vector<8x256xbf16>
    %12 = vector.shape_cast %9 : vector<8x256xbf16> to vector<1x8x256xbf16>
    tpu.vector_store %arg5[%c0_6, %c0_7, %c0_8], %12 {strides = array<i32>} : memref<1x8x256xbf16, #tpu.memory_space<vmem>>, vector<1x8x256xbf16>,
    %13 = vector.extract_strided_slice %7 {offsets = [8, 0], sizes = [8, 256], strides = [1, 1]} : vector<48x256xf32> to vector<8x256xf32>
    %14 = arith.truncf %13 : vector<8x256xf32> to vector<8x256xbf16>
    %c0_9 = arith.constant 0 : index
    %c0_10 = arith.constant 0 : index
    %c0_11 = arith.constant 0 : index
    %15 = vector.load %arg6[%c0_9, %c0_10, %c0_11] : memref<1x8x256xbf16, #tpu.memory_space<vmem>>, vector<1x8x256xbf16>
    %16 = vector.shape_cast %15 : vector<1x8x256xbf16> to vector<8x256xbf16>
    %17 = vector.shape_cast %14 : vector<8x256xbf16> to vector<1x8x256xbf16>
    tpu.vector_store %arg6[%c0_9, %c0_10, %c0_11], %17 {strides = array<i32>} : memref<1x8x256xbf16, #tpu.memory_space<vmem>>, vector<1x8x256xbf16>,
    %18 = vector.extract_strided_slice %7 {offsets = [16, 0], sizes = [32, 256], strides = [1, 1]} : vector<48x256xf32> to vector<32x256xf32>
    %19 = arith.truncf %18 : vector<32x256xf32> to vector<32x256xbf16>
    %c0_12 = arith.constant 0 : index
    %c0_13 = arith.constant 0 : index
    %c0_14 = arith.constant 0 : index
    %20 = vector.load %arg7[%c0_12, %c0_13, %c0_14] : memref<1x32x256xbf16, #tpu.memory_space<vmem>>, vector<1x32x256xbf16>
    %21 = vector.shape_cast %20 : vector<1x32x256xbf16> to vector<32x256xbf16>
    %22 = vector.shape_cast %19 : vector<32x256xbf16> to vector<1x32x256xbf16>
    tpu.vector_store %arg7[%c0_12, %c0_13, %c0_14], %22 {strides = array<i32>} : memref<1x32x256xbf16, #tpu.memory_space<vmem>>, vector<1x32x256xbf16>,
    return
  }
  func.func @transform_0(%arg0: i32, %arg1: i32) -> (i32, i32, i32) {
    %c0_i32 = arith.constant 0 : i32
    %c0_i32_0 = arith.constant 0 : i32
    return %arg0, %c0_i32, %arg1 : i32, i32, i32
  }
  func.func @transform_1(%arg0: i32, %arg1: i32) -> (i32, i32) {
    %c0_i32 = arith.constant 0 : i32
    %c0_i32_0 = arith.constant 0 : i32
    %c0_i32_1 = arith.constant 0 : i32
    return %c0_i32, %c0_i32_0 : i32, i32
  }
  func.func @transform_2(%arg0: i32, %arg1: i32) -> (i32, i32) {
    %c0_i32 = arith.constant 0 : i32
    %c0_i32_0 = arith.constant 0 : i32
    %c0_i32_1 = arith.constant 0 : i32
    return %c0_i32, %c0_i32_0 : i32, i32
  }
  func.func @transform_3(%arg0: i32, %arg1: i32) -> (i32, i32, i32) {
    %c0_i32 = arith.constant 0 : i32
    %c0_i32_0 = arith.constant 0 : i32
    return %arg0, %c0_i32, %arg1 : i32, i32, i32
  }
  func.func @transform_4(%arg0: i32, %arg1: i32) -> (i32, i32, i32) {
    %c0_i32 = arith.constant 0 : i32
    %c0_i32_0 = arith.constant 0 : i32
    return %arg0, %c0_i32, %arg1 : i32, i32, i32
  }
  func.func @transform_5(%arg0: i32, %arg1: i32) -> (i32, i32, i32) {
    %c0_i32 = arith.constant 0 : i32
    %c0_i32_0 = arith.constant 0 : i32
    return %arg0, %c0_i32, %arg1 : i32, i32, i32
  }
}

</mosaic_0001>

<bundles_post_ra>
// kernel: tpu_custom_call.1
= control target key start
LH: loop header
LB: loop body
LE: loop exit
PB: predicated region body
PF: predicated region fallthrough
CT: control target
= control target key end

     0   :  { %s1319_s0 = inlined_call_operand.hbm [shape: f32[2,32,256], index: 0, kind: input, shape index: {}]   ;;  %s1320_s1 = inlined_call_operand.vmem [shape: bf16[48,32], index: 1, kind: input, shape index: {}]   ;;  %s1321_s2 = inlined_call_operand.vmem [shape: f32[48,1], index: 2, kind: input, shape index: {}]   ;;  %s1322_s3 = inlined_call_operand.hbm [shape: bf16[2,8,256], index: 3, kind: output, shape index: {0}]   ;;  %s1323_s4 = inlined_call_operand.hbm [shape: bf16[2,8,256], index: 4, kind: output, shape index: {1}]   ;;  %s1324_s5 = inlined_call_operand.hbm [shape: bf16[2,32,256], index: 5, kind: output, shape index: {2}]  }
   0x1   :  { %1327 = sst [smem:[#allocation12_spill]] %s1319_s0 }
   0x2   :  { %1328 = sst [smem:[#allocation13_spill]] %s1320_s1 }
   0x3   :  { %11 = vsyncpa [#allocation3], 0 }
   0x4   :  { %13 = vsyncpa [#allocation3 + $0x1], 0 }
   0x5   :  { %14 = vsyncpa [#allocation4], 0 }
   0x6   :  { %16 = vsyncpa [#allocation4 + $0x1], 0 }
   0x7   :  { %17 = vsyncpa [#allocation7], 0 }
   0x8   :  { %19 = vsyncpa [#allocation7 + $0x1], 0  ;;  %s1032_s18 = smov 0   ;;  %s1034_s19 = smov 0  }
   0x9   :  { %s1036_s20 = smov 0   ;;  %s1038_s21 = smov 0  }
   0xa   :  { %s1040_s22 = smov 0   ;;  %s1042_s23 = smov 0  }
   0xb LB: > { %s1063_s24 = sadd.s32 4294967295, %s991_s23   ;;  %s1326_s25 = sadd.s32 4294967294, %s991_s23   ;;  %s991_s23 = sphi %s1042_s23, %s25_s23   ;;  %s987_s22 = sphi %s1040_s22, %s1346_s22   ;;  %s983_s21 = sphi %s1038_s21, %s1345_s21   ;;  %s979_s20 = sphi %s1036_s20, %s1344_s20   ;;  %s975_s19 = sphi %s1034_s19, %s1343_s19   ;;  %s971_s18 = sphi %s1032_s18, %s1342_s18  }
   0xc   : > { %s37_s26 = sadd.s32 1, %s987_s22  ;;  %s46_s27 = sadd.s32 1, %s979_s20 }
   0xd   : > { %p39_p0 = scmp.ge.s32.totalorder %s37_s26, 2  ;;  %p53_p1 = scmp.ne.s32.totalorder %s979_s20, %s975_s19 }
   0xe   : > { %p54_p2 = scmp.eq.s32.totalorder %s991_s23, 0  ;;  %p59_p3 = scmp.ne.s32.totalorder %s975_s19, %s971_s18 }
   0xf   : > { %s1348_s26 = smov (%p39_p0, %s37_s26), 0  ;;  %p60_p5 = scmp.eq.s32.totalorder %s1063_s24, 0 }
  0x10   : > { %p1075_p4 = por %p54_p2, %p53_p1  ;;  %s41_s29 = ssub.s32 %s987_s22, %s1348_s26 }
  0x11   : > { %p127_p6 = scmp.eq.s32.totalorder %s1063_s24, 1  ;;  %p44_p7 = scmp.eq.s32.totalorder %s41_s29, 0 }
  0x12   : > { %p1083_p8 = por %p60_p5, %p59_p3  ;;  %p133_p10 = scmp.eq.s32.totalorder %s1326_s25, 1 }
  0x13   : > { %p1087_p9 = por %p127_p6, %p53_p1  ;;  %p759_p13 = scmp.lt.s32.totalorder %s991_s23, 2 }
  0x14   : > { %s1094_s7 = scalar_select %p44_p7, %s979_s20, %s46_s27  }
  0x15   : > { %s1331_s6 = scalar_select %p1087_p9, 1, 0 }
  0x16   : > { %p1096_p11 = por %p133_p10, %p59_p3  ;;  %s215_s9 = sand.u32 1, %s979_s20  }
  0x17   : > { %s692_s10 = sshll.u32 %s215_s9, 6  ;;  %s723_s11 = sshll.u32 %s987_s22, 10 }
  0x18   : > { %s1332_s8 = scalar_select %p1096_p11, 1, 0 }
  0x19   : > { %s1333_s0 = sld [smem:[#allocation12_spill]]  ;;  %s219_s15 = scalar_lea.vmem [#allocation2], %s692_s10 }
  0x1a   : > { %s228_s16 = sshll.u32 %s219_s15, 4  ;;  %p1113_p0 = pnand %p759_p13, %p1075_p4  ;;  %s1109_s16 = int_to_ptr.vmem [resolvable:$true] %s228_s16 }
  0x1b   : > { %s1118_s27 = scalar_lea.sflag [#allocation3], %s215_s9 }
  0x1c   : > { %p821_p3 = pneg %p1113_p0 }
  0x1f   : > { %s1107_s14 = scalar_lea.hbm %s1333_s0, %s723_s11  ;;  %s824_s28 = scalar_lea.hbm %s1333_s0, 2048 }
  0x20   : > { %s819_s29 = scalar_lea.hbm %s1107_s14, 1024  ;;  %p825_p4 = scmp.lt.u32.totalorder %s1107_s14, %s1333_s0 }
  0x21   : > { %p820_p2 = scmp.ne.s32.totalorder %s1107_s14, %s819_s29  ;;  %p826_p7 = scmp.lt.u32.totalorder %s824_s28, %s819_s29 }
  0x22   : > { %p828_p13 = scmp.lt.u32.totalorder %s819_s29, %s1107_s14 }
  0x23   : > { %p822_p5 = pnand %p821_p3, %p820_p2  ;;  %p827_p10 = por %p826_p7, %p825_p4 }
  0x25   : > { %p823_p6 = pneg %p822_p5  ;;  %p829_p12 = por %p828_p13, %p827_p10 }
  0x27   : > { %p830_p1 = pnand %p829_p12, %p823_p6 }
  0x29   : > { %833 = shalt.err (!%p830_p1)
}
  0x2a   : > { %s834_s9 = scalar_lea.vmem %s1109_s16, 1024  ;;  %s993_s15 = smov [#allocation2]  }
  0x2b   : > { %p835_p2 = scmp.ne.s32.totalorder %s1109_s16, %s834_s9  ;;  %s839_s10 = sshll.u32 %s993_s15, 4  ;;  %s840_s10 = int_to_ptr.vmem [resolvable:$false] %s839_s10 }
  0x2c   : > { %s841_s11 = scalar_lea.vmem %s840_s10, 2048  ;;  %p842_p9 = scmp.lt.s32.totalorder %s1109_s16, %s840_s10 }
  0x2d   : > { %p837_p5 = pnand %p835_p2, %p821_p3  ;;  %p843_p4 = scmp.lt.s32.totalorder %s841_s11, %s834_s9 }
  0x2f   : > { %p838_p11 = pneg %p837_p5  ;;  %p844_p7 = por %p843_p4, %p842_p9 }
  0x31   : > { %p845_p10 = pnand %p844_p7, %p838_p11 }
  0x33   : > { %848 = shalt.err (!%p845_p10)
}
  0x34   : > { %s994_s29 = smov 256   ;;  %s995_s28 = smov 16  }
  0x35   : > { %748 = dma.hbm_to_vmem [thread:$0]  (!%p1113_p0), %s1107_s14, 1024, %s1109_s16, %s1118_s27, %s994_s29, %s994_s29, %s995_s28  }
  0x36   : > { %p236_p12 = scmp.lt.s32.totalorder %s991_s23, 3  ;;  %p1335_p1 = scmp.ge.s32.totalorder %s991_s23, 1 }
  0x38   : > { %p237_p3 = pnand %p1335_p1, %p236_p12 }
  0x39   : > { %s1150_s12 = sand.u32 (!%p237_p3), 1, %s975_s19  }
  0x3a   : > { %240 = sbr.rel (%p237_p3) target bundleno = 357 (0x165), region = 32  ;;  %s696_s13 = sshll.u32 (!%p237_p3), %s1150_s12, 6 }
  0x3b   : > { %s243_s9 = scalar_lea.sflag (!%p237_p3), [#allocation3], %s1150_s12  ;;  %s246_s15 = scalar_lea.vmem (!%p237_p3), [#allocation2], %s696_s13 }
  0x41   : > { %958 = dma.done.wait (%p1083_p8), %s243_s9, 1024  }
  0x42   : > { %960 = vsyncadd (%p1083_p8), %s243_s9, 4294966272  ;;  %v996_v0 = vmov 0   ;;  %v289_v1 = vld [vmem:[%s246_s15 + $0x8] sm:$0xff]  ;;  %v291_v2 = vld [vmem:[%s246_s15 + $0x18] sm:$0xff]  ;;  %s1336_s1 = sld [smem:[#allocation13_spill]]  ;;  %vm357_vm0 = vcmask 261120  }
  0x43   : > { %399 = vmatprep.mubr.bf16.mxu0 %v996_v0  ;;  %409 = vmatprep.mubr.bf16.mxu1 %v996_v0  ;;  %v288_v3 = vld [vmem:[%s246_s15] sm:$0xff]  ;;  %v297_v4 = vpack.c.bf16 %v291_v2, %v289_v1  ;;  %v290_v5 = vld [vmem:[%s246_s15 + $0x10] sm:$0xff]  ;;  %v293_v6 = vld [vmem:[%s246_s15 + $0x28] sm:$0xff]  ;;  %s699_s11 = sshll.u32 %s1150_s12, 5  ;;  %s697_s29 = sshll.u32 %s1150_s12, 3 }
  0x44   : > { %815 = vset.pattern.permute.xlu1 %v996_v0  ;;  %814 = vset.pattern.permute.xlu0 %v996_v0  ;;  %v295_v7 = vld [vmem:[%s246_s15 + $0x38] sm:$0xff]  ;;  %v296_v8 = vpack.c.bf16 %v290_v5, %v288_v3  ;;  %v292_v10 = vld [vmem:[%s246_s15 + $0x20] sm:$0xff]  ;;  %v294_v11 = vld [vmem:[%s246_s15 + $0x30] sm:$0xff]  ;;  %s730_s28 = sshll.u32 %s983_s21, 7  ;;  %s268_s13 = scalar_lea.vmem [#allocation5], %s697_s29 }
  0x45   : > { %v299_v9 = vpack.c.bf16 %v295_v7, %v293_v6  ;;  %367 = vmatprep.subr.bf16.mxu0 %v297_v4  ;;  %733 = vmatprep.subr.bf16.mxu1 %v297_v4  ;;  %v298_v12 = vpack.c.bf16 %v294_v11, %v292_v10  ;;  %v308_v13 = vld [vmem:[%s1321_s2 + $0x10] sm:$0xff]  ;;  %v307_v14 = vld [vmem:[%s1321_s2 + $0x8] sm:$0xff]  ;;  %v309_v17 = vld [vmem:[%s1321_s2 + $0x18] sm:$0xff]  ;;  %s503_s9 = sshll.u32 %s268_s13, 4  ;;  %s1189_s30 = scalar_lea.vmem [#allocation6], %s697_s29  ;;  %s1197_s9 = int_to_ptr.vmem [resolvable:$true] %s503_s9 }
  0x46   : > { %368 = vmatpush1.bf16.msra.mxu0 %v296_v8  ;;  %735 = vmatpush1.bf16.msra.mxu1 %v296_v8  ;;  %v306_v18 = vld [vmem:[%s1321_s2] sm:$0xff]  ;;  %v311_v19 = vld [vmem:[%s1321_s2 + $0x28] sm:$0xff]  ;;  %s519_s14 = sshll.u32 %s1189_s30, 4  ;;  %s1195_s27 = scalar_lea.hbm %s1322_s3, %s730_s28  ;;  %s1209_s14 = int_to_ptr.vmem [resolvable:$true] %s519_s14 }
  0x47   : > { %369 = vmatprep.subr.bf16.mxu0 %v299_v9  ;;  %734 = vmatprep.subr.bf16.mxu1 %v299_v9  ;;  %v310_v20 = vld [vmem:[%s1321_s2 + $0x20] sm:$0xff]  ;;  %s1201_s10 = scalar_lea.vmem [#allocation8], %s699_s11  ;;  %s1207_s15 = scalar_lea.hbm %s1323_s4, %s730_s28 }
  0x48   : > { %324 = vperm.xlu1 %815, %v308_v13   ;;  %v816_v15 = vld [vmem:[%s1336_s1] sm:$0xff]   ;;  %v817_v16 = vld [vmem:[%s1336_s1 + $0x8] sm:$0xff]   ;;  %319 = vperm.xlu0 %814, %v307_v14   ;;  %v818_v21 = vld [vmem:[%s1336_s1 + $0x10] sm:$0xff]   ;;  %s477_s16 = scalar_lea.sflag [#allocation4], %s1150_s12  ;;  %s849_s17 = scalar_lea.vmem %s1197_s9, 128 }
  0x49   : > { %p850_p8 = scmp.ne.s32.totalorder %s1197_s9, %s849_s17  ;;  %p1337_p9 = scmp.ne.s32.totalorder %s1331_s6, 0 }
  0x4a   : > { %370 = vmatpush1.bf16.msra.mxu0 %v298_v12  ;;  %736 = vmatpush1.bf16.msra.mxu1 %v298_v12  ;;  %s997_s11 = smov [#allocation5]  }
  0x4b   : > { %p851_p11 = pnand %p850_p8, %p1337_p9  ;;  %s853_s0 = sshll.u32 %s997_s11, 4  ;;  %s854_s0 = int_to_ptr.vmem [resolvable:$false] %s853_s0 }
  0x4c   : > { %329 = vperm.xlu1 %815, %v309_v17   ;;  %314 = vperm.xlu0 %814, %v306_v18   ;;  %s855_s1 = scalar_lea.vmem %s854_s0, 256  ;;  %p856_p6 = scmp.lt.s32.totalorder %s1197_s9, %s854_s0 }
  0x4d   : > { %703 = vmatmul.mubr.msk.bf16.vlgmr.msra.gmra.mrb[0].mxu0 %vm357_vm0, %v816_v15  ;;  %704 = vmatmul.mubr.msk.bf16.vlgmr.msra.gmra.mrb[0].mxu1 %vm357_vm0, %v817_v16  ;;  %p852_p0 = pneg %p851_p11  ;;  %p857_p13 = scmp.lt.s32.totalorder %s855_s1, %s849_s17 }
  0x4e   : > { %419 = vmatprep.mubr.bf16.mxu1 %v996_v0 }
  0x4f   : > { %p858_p2 = por %p857_p13, %p856_p6 }
  0x50   : > { %339 = vperm.xlu1 %815, %v311_v19   ;;  %334 = vperm.xlu0 %814, %v310_v20  }
  0x51   : > { %p859_p5 = pnand %p858_p2, %p852_p0 }
  0x55   : > { %705 = vmatmul.mubr.msk.bf16.gmra.mrb[4].mxu1 %vm357_vm0, %v818_v21 }
  0xc7   : > { %v325_v22 = vpop.permute.xlu1 %324  ;;  %v320_v23 = vpop.permute.xlu0 %319 }
  0xcb   : > { %v330_v24 = vpop.permute.xlu1 %329  ;;  %v315_v25 = vpop.permute.xlu0 %314 }
 0x120   : > { %v401_v26 = vpop.f32.mrb[0].mxu0  ;;  %v411_v27 = vpop.f32.mrb[0].mxu1 }
 0x121   : > { %v402_v28 = vadd.f32 %v401_v26, %v315_v25  ;;  %v412_v29 = vadd.f32 %v411_v27, %v325_v22  ;;  %v403_v30 = vpop.f32.mrb[1].mxu0  ;;  %v413_v31 = vpop.f32.mrb[1].mxu1 }
 0x122   : > { %v404_v32 = vadd.f32 %v403_v30, %v315_v25  ;;  %v414_v33 = vadd.f32 %v413_v31, %v325_v22  ;;  %v405_v34 = vpop.f32.mrb[2].mxu0  ;;  %v415_v35 = vpop.f32.mrb[2].mxu1 }
 0x123   : > { %v406_v36 = vadd.f32 %v405_v34, %v320_v23  ;;  %v416_v37 = vadd.f32 %v415_v35, %v330_v24  ;;  %v407_v38 = vpop.f32.mrb[3].mxu0  ;;  %v417_v39 = vpop.f32.mrb[3].mxu1 }
 0x124   : > { %v724_v40 = vpack.c.bf16 %v404_v32, %v402_v28  ;;  %v726_v41 = vpack.c.bf16 %v414_v33, %v412_v29  ;;  %v408_v42 = vadd.f32 %v407_v38, %v320_v23  ;;  %v418_v43 = vadd.f32 %v417_v39, %v330_v24 }
 0x126   : > { %472 = vst [vmem:[%s1201_s10] sm:$0xff] %v726_v41  ;;  %v725_v44 = vpack.c.bf16 %v408_v42, %v406_v36  ;;  %v727_v45 = vpack.c.bf16 %v418_v43, %v416_v37  ;;  %438 = vst [vmem:[%s268_s13] sm:$0xff] %v724_v40 }
 0x127   : > { %862 = shalt.err (!%p859_p5)
}
 0x128   : > { %s863_s25 = scalar_lea.hbm %s1195_s27, 128  ;;  %s867_s13 = scalar_lea.hbm %s1322_s3, 256 }
 0x129   : > { %p864_p4 = scmp.ne.s32.totalorder %s1195_s27, %s863_s25  ;;  %p868_p12 = scmp.lt.u32.totalorder %s1195_s27, %s1322_s3 }
 0x12a   : > { %p869_p1 = scmp.lt.u32.totalorder %s867_s13, %s863_s25  ;;  %p871_p8 = scmp.lt.u32.totalorder %s863_s25, %s1195_s27 }
 0x12b   : > { %p865_p7 = pnand %p864_p4, %p1337_p9 }
 0x12c   : > { %p870_p3 = por %p869_p1, %p868_p12 }
 0x12d   : > { %p866_p10 = pneg %p865_p7 }
 0x12e   : > { %p872_p11 = por %p871_p8, %p870_p3 }
 0x130   : > { %p873_p0 = pnand %p872_p11, %p866_p10 }
 0x132   : > { %876 = shalt.err (!%p873_p0)
}
 0x133   : > { %739 = dma.vmem_to_hbm [thread:$0]  (%p1337_p9), %s1197_s9, 128, %s1195_s27, %s477_s16   ;;  %v335_v46 = vpop.permute.xlu0 %334  ;;  %473 = vst [vmem:[%s1201_s10 + $0x8] sm:$0xff] %v727_v45  ;;  %v421_v47 = vpop.f32.mrb[4].mxu1  ;;  %447 = vst [vmem:[%s1189_s30] sm:$0xff] %v725_v44 }
 0x134   : > { %v422_v48 = vadd.f32 %v421_v47, %v335_v46  ;;  %v423_v49 = vpop.f32.mrb[5].mxu1  ;;  %s1338_s1 = sand.u32 1, %s1063_s24   ;;  %s877_s11 = scalar_lea.vmem %s1209_s14, 128 }
 0x135   : > { %s1237_s17 = scalar_lea.sflag [#allocation7], %s1338_s1  ;;  %p878_p6 = scmp.ne.s32.totalorder %s1209_s14, %s877_s11 }
 0x136   : > { %s998_s25 = smov [#allocation6]  }
 0x137   : > { %p879_p13 = pnand %p878_p6, %p1337_p9  ;;  %s881_s12 = sshll.u32 %s998_s25, 4  ;;  %s882_s12 = int_to_ptr.vmem [resolvable:$false] %s881_s12 }
 0x138   : > { %s883_s28 = scalar_lea.vmem %s882_s12, 256  ;;  %p884_p5 = scmp.lt.s32.totalorder %s1209_s14, %s882_s12 }
 0x139   : > { %p880_p2 = pneg %p879_p13  ;;  %p885_p4 = scmp.lt.s32.totalorder %s883_s28, %s877_s11 }
 0x13b   : > { %p886_p7 = por %p885_p4, %p884_p5 }
 0x13d   : > { %p887_p10 = pnand %p886_p7, %p880_p2 }
 0x13f   : > { %890 = shalt.err (!%p887_p10)
}
 0x140   : > { %s891_s24 = scalar_lea.hbm %s1207_s15, 128  ;;  %s895_s27 = scalar_lea.hbm %s1323_s4, 256 }
 0x141   : > { %p892_p12 = scmp.ne.s32.totalorder %s1207_s15, %s891_s24  ;;  %p896_p8 = scmp.lt.u32.totalorder %s1207_s15, %s1323_s4 }
 0x142   : > { %p897_p11 = scmp.lt.u32.totalorder %s895_s27, %s891_s24  ;;  %p899_p6 = scmp.lt.u32.totalorder %s891_s24, %s1207_s15 }
 0x143   : > { %p893_p1 = pnand %p892_p12, %p1337_p9 }
 0x144   : > { %p898_p0 = por %p897_p11, %p896_p8 }
 0x145   : > { %p894_p3 = pneg %p893_p1 }
 0x146   : > { %p900_p13 = por %p899_p6, %p898_p0 }
 0x148   : > { %p901_p2 = pnand %p900_p13, %p894_p3 }
 0x14a   : > { %904 = shalt.err (!%p901_p2)
}
 0x14b   : > { %740 = dma.vmem_to_hbm [thread:$0]  (%p1337_p9), %s1209_s14, 128, %s1207_s15, %s1237_s17   ;;  %v340_v50 = vpop.permute.xlu1 %339  ;;  %v424_v51 = vadd.f32 %v423_v49, %v335_v46  ;;  %v425_v52 = vpop.f32.mrb[6].mxu1 }
 0x14c   : > { %s534_s29 = sshll.u32 %s1201_s10, 4  ;;  %s732_s0 = sshll.u32 %s983_s21, 9  ;;  %v426_v53 = vadd.f32 %v425_v52, %v340_v50  ;;  %v427_v54 = vpop.f32.mrb[7].mxu1  ;;  %s1263_s29 = int_to_ptr.vmem [resolvable:$true] %s534_s29 }
 0x14d   : > { %v728_v55 = vpack.c.bf16 %v424_v51, %v422_v48  ;;  %v428_v56 = vadd.f32 %v427_v54, %v340_v50  ;;  %s1268_s25 = scalar_lea.hbm %s1324_s5, %s732_s0  ;;  %s905_s15 = scalar_lea.vmem %s1263_s29, 512 }
 0x14e   : > { %p906_p5 = scmp.ne.s32.totalorder %s1263_s29, %s905_s15  ;;  %s999_s21 = smov [#allocation8]  }
 0x14f   : > { %474 = vst [vmem:[%s1201_s10 + $0x10] sm:$0xff] %v728_v55  ;;  %v729_v57 = vpack.c.bf16 %v428_v56, %v426_v53  ;;  %s909_s14 = sshll.u32 %s999_s21, 4  ;;  %s910_s14 = int_to_ptr.vmem [resolvable:$false] %s909_s14 }
 0x150   : > { %p907_p4 = pnand %p906_p5, %p1337_p9  ;;  %s911_s12 = scalar_lea.vmem %s910_s14, 1024 }
 0x151   : > { %475 = vst [vmem:[%s1201_s10 + $0x18] sm:$0xff] %v729_v57  ;;  %p912_p10 = scmp.lt.s32.totalorder %s1263_s29, %s910_s14  ;;  %p913_p12 = scmp.lt.s32.totalorder %s911_s12, %s905_s15 }
 0x152   : > { %p908_p7 = pneg %p907_p4 }
 0x153   : > { %p914_p1 = por %p913_p12, %p912_p10 }
 0x155   : > { %p915_p3 = pnand %p914_p1, %p908_p7 }
 0x157   : > { %918 = shalt.err (!%p915_p3)
}
 0x158   : > { %s919_s10 = scalar_lea.hbm %s1268_s25, 512  ;;  %s923_s9 = scalar_lea.hbm %s1324_s5, 1024 }
 0x159   : > { %p920_p8 = scmp.ne.s32.totalorder %s1268_s25, %s919_s10  ;;  %p924_p6 = scmp.lt.u32.totalorder %s1268_s25, %s1324_s5 }
 0x15a   : > { %p925_p13 = scmp.lt.u32.totalorder %s923_s9, %s919_s10  ;;  %p927_p5 = scmp.lt.u32.totalorder %s919_s10, %s1268_s25 }
 0x15b   : > { %p921_p11 = pnand %p920_p8, %p1337_p9 }
 0x15c   : > { %p926_p2 = por %p925_p13, %p924_p6 }
 0x15d   : > { %p922_p0 = pneg %p921_p11 }
 0x15e   : > { %p928_p4 = por %p927_p5, %p926_p2 }
 0x160   : > { %p929_p7 = pnand %p928_p4, %p922_p0 }
 0x162   : > { %932 = shalt.err (!%p929_p7)
}
 0x163   : > { %s1000_s16 = smov 128   ;;  %s1001_s13 = smov 8  }
 0x164   : > { %741 = dma.vmem_to_hbm [thread:$0]  (%p1337_p9), %s1263_s29, 512, %s1268_s25, %s1237_s17, %s1000_s16, %s1000_s16, %s1001_s13  }
 0x165 PF: > { %s549_s0 = sand.u32 1, %s971_s18   ;;  %p1339_p10 = scmp.ne.s32.totalorder %s1332_s8, 0 }
 0x166   : > { %p1340_p12 = scmp.ge.s32.totalorder %s991_s23, 2  ;;  %s550_s1 = scalar_lea.sflag [#allocation4], %s549_s0 }
 0x168   : > { %p750_p1 = pnand %p1340_p12, %p1339_p10 }
 0x16a   : > { %962 = dma.done.wait (!%p750_p1), %s550_s1, 128  }
 0x16b   : > { %964 = vsyncadd (!%p750_p1), %s550_s1, 4294967168  ;;  %s1341_s11 = sadd.s32 4294967294, %s991_s23  }
 0x16c   : > { %s558_s15 = sand.u32 1, %s1341_s11  }
 0x16d   : > { %s559_s21 = scalar_lea.sflag [#allocation7], %s558_s15 }
 0x16e   : > { %966 = dma.done.wait (!%p750_p1), %s559_s21, 640  }
 0x16f   : > { %968 = vsyncadd (!%p750_p1), %s559_s21, 4294966656  ;;  %s25_s23 = sadd.s32 1, %s991_s23   ;;  %s1342_s18 = smov %s975_s19 }
 0x170   : > { %p22_p9 = scmp.ge.s32.totalorder %s25_s23, 4   ;;  %s1343_s19 = smov %s979_s20 }
 0x171   : > { %s1344_s20 = smov %s1094_s7  ;;  %s1345_s21 = smov %s987_s22 }
 0x172   : > { %s1346_s22 = smov %s1348_s26  ;;  %24 = sbr.rel (!%p22_p9) target bundleno = 11 (0xb), region = 109 }
 0x179   :  { %573 = vsyncpa [#allocation3], 1 }
 0x17a   :  { %575 = vsyncpa [#allocation3 + $0x1], 1 }
 0x17b   :  { %576 = vsyncpa [#allocation4], 1 }
 0x17c   :  { %578 = vsyncpa [#allocation4 + $0x1], 1 }
 0x17d   :  { %579 = vsyncpa [#allocation7], 1 }
 0x17e   :  { %581 = vsyncpa [#allocation7 + $0x1], 1 }

</bundles_post_ra>
